<compile_context>
chip_gen: v6e
topology: v6e:2x2x1
jax: 0.10.0
libtpu: 0.0.40
codegen_flags: <defaults>
</compile_context>

<pallas_src>
import jax
import jax.numpy as jnp
import numpy as np
from jax import lax
from jax.experimental import pallas as pl
from jax.experimental.pallas import tpu as pltpu


def _round_up(x, m):
    return ((x + m - 1) // m) * m


# --------------------------- kernel 1: embedding table ------------------------
# Single invocation: emb[k] = x @ W[k] + b[k] for k in {sub_re, sub_im, obj_re, obj_im}.
# bf16 operands, f32 accumulation, bf16 table output.

def _embed_kernel(x_ref, w_ref, b_ref, emb_ref):
    x = x_ref[...]
    for k in range(4):                                    # static unroll: 4 MXU dots
        emb_ref[k] = (jnp.dot(x, w_ref[k], preferred_element_type=jnp.float32)
                      + b_ref[k]).astype(emb_ref.dtype)


# ------------------------ kernel 2: relation scoring ---------------------------
# Grid over relation-row tiles (parallel). Per tile: one-hot MXU gather of the four
# embedding planes, ComplEx element-wise products on the VPU, two K=E MXU dots
# against the lane-dense (padded to 128) relation weights.

def _relation_kernel(sidx_ref, oidx_ref, u_ref, emb_ref, wre_ref, wim_ref, o_ref):
    tile_r = u_ref.shape[0]
    n_pad = emb_ref.shape[1]
    cdt = emb_ref.dtype                                   # bf16 compute dtype

    lane = lax.broadcasted_iota(jnp.int32, (tile_r, n_pad), 1)
    oh_s = jnp.where(lane == sidx_ref[...], 1.0, 0.0).astype(cdt)   # [tile_r, n_pad]
    oh_o = jnp.where(lane == oidx_ref[...], 1.0, 0.0).astype(cdt)

    # Exact MXU gathers (one-hot x bf16 table, f32 accumulation).
    sre = jnp.dot(oh_s, emb_ref[0], preferred_element_type=jnp.float32)
    sim = jnp.dot(oh_s, emb_ref[1], preferred_element_type=jnp.float32)
    ore = jnp.dot(oh_o, emb_ref[2], preferred_element_type=jnp.float32)
    oim = jnp.dot(oh_o, emb_ref[3], preferred_element_type=jnp.float32)

    u = u_ref[...]
    u2 = u * u                                            # union_feat appears squared
    re = ((sre * ore + sim * oim) * u2).astype(cdt)
    im = ((sre * oim - sim * ore) * u2).astype(cdt)

    o_ref[...] = (jnp.dot(re, wre_ref[...], preferred_element_type=jnp.float32)
                  + jnp.dot(im, wim_ref[...], preferred_element_type=jnp.float32)
                  ).astype(o_ref.dtype)


# ------------------------------- wrapper ---------------------------------------

def complex_embed_forward(prepped, obj_pre, union_feat, rel_ind, *, tile_r=128):
    """Eval-mode forward of Complex_Embed (dropout = identity)."""
    w_emb, b_emb = prepped["w_emb"], prepped["b_emb"]
    w_re, w_im = prepped["w_re"], prepped["w_im"]
    E, num_rel = prepped["embed_dim"], prepped["num_rel"]
    cdt = w_emb.dtype

    N, input_dim = obj_pre.shape
    R = union_feat.shape[0]
    nrp = w_re.shape[1]                         # num_rel padded to lane width (128)

    tile_r = max(8, min(tile_r, _round_up(R, 8)))   # avoid over-padding tiny R
    assert tile_r % 8 == 0
    n_pad = _round_up(N, 8)
    r_pad = _round_up(R, tile_r)

    x_p = jnp.pad(obj_pre, ((0, n_pad - N), (0, 0))).astype(cdt)
    union_p = jnp.pad(union_feat, ((0, r_pad - R), (0, 0)))
    # Padded relation rows use index 0 (gather emb row 0); they are sliced off below,
    # so this is harmless.
    sub_idx = jnp.pad(rel_ind[:, 1].astype(jnp.int32), (0, r_pad - R)).reshape(r_pad, 1)
    obj_idx = jnp.pad(rel_ind[:, 2].astype(jnp.int32), (0, r_pad - R)).reshape(r_pad, 1)

    # ---- Phase A: embedding table (hoisted out of the relation grid) ----
    emb = pl.pallas_call(
        _embed_kernel,
        grid=(1,),
        in_specs=[
            pl.BlockSpec((n_pad, input_dim), lambda i: (0, 0)),
            pl.BlockSpec((4, input_dim, E), lambda i: (0, 0, 0)),
            pl.BlockSpec((4, 1, E), lambda i: (0, 0, 0)),
        ],
        out_specs=pl.BlockSpec((4, n_pad, E), lambda i: (0, 0, 0)),
        out_shape=jax.ShapeDtypeStruct((4, n_pad, E), cdt),
    )(x_p, w_emb, b_emb)

    # ---- Phase B: relation tiles (parallel grid, megacore-shardable) ----
    isz = jnp.dtype(cdt).itemsize
    est = 2 * (4 * n_pad * E * isz          # resident emb table (double buffered)
               + 2 * E * nrp * isz          # relation weights
               + tile_r * E * 4             # union_feat tile
               + 2 * tile_r * 128 * 4       # index tiles (lane padded)
               + tile_r * nrp * 4)          # output tile
    vmem_limit = int(min(max(est + (4 << 20), 32 << 20), 64 << 20))
    # Constant-index inputs (emb, w_re, w_im) are only fetched once; single-buffering
    # them (pipeline_mode=pl.Buffered(1)) would further trim VMEM if needed.

    out = pl.pallas_call(
        _relation_kernel,
        grid=(r_pad // tile_r,),
        in_specs=[
            pl.BlockSpec((tile_r, 1), lambda i: (i, 0)),       # subject indices
            pl.BlockSpec((tile_r, 1), lambda i: (i, 0)),       # object indices
            pl.BlockSpec((tile_r, E), lambda i: (i, 0)),       # union_feat tile
            pl.BlockSpec((4, n_pad, E), lambda i: (0, 0, 0)),  # embedding table (const)
            pl.BlockSpec((E, nrp), lambda i: (0, 0)),          # W_rel_re (padded, const)
            pl.BlockSpec((E, nrp), lambda i: (0, 0)),          # W_rel_im (padded, const)
        ],
        out_specs=pl.BlockSpec((tile_r, nrp), lambda i: (i, 0)),
        out_shape=jax.ShapeDtypeStruct((r_pad, nrp), jnp.float32),
        compiler_params=pltpu.CompilerParams(
            dimension_semantics=("parallel",),
            vmem_limit_bytes=vmem_limit),
    )(sub_idx, obj_idx, union_p, emb, w_re, w_im)

    return out[:R, :num_rel]


# -------------------------- parameter construction -----------------------------

def xavier_normal(key, fan_in, fan_out):
    std = np.sqrt(2.0 / (fan_in + fan_out))
    # stored as [in, out] (transpose of PyTorch's [out, in]); distribution is symmetric.
    return std * jax.random.normal(key, (fan_in, fan_out), dtype=jnp.float32)


def init_params(key, input_dim, embed_dim, num_rel):
    ks = jax.random.split(key, 10)
    bound = 1.0 / np.sqrt(input_dim)  # PyTorch default Linear bias init range
    return {
        "w_sub_re": xavier_normal(ks[0], input_dim, embed_dim),
        "w_obj_re": xavier_normal(ks[1], input_dim, embed_dim),
        "w_sub_im": xavier_normal(ks[2], input_dim, embed_dim),
        "w_obj_im": xavier_normal(ks[3], input_dim, embed_dim),
        "b_sub_re": jax.random.uniform(ks[4], (embed_dim,), jnp.float32, -bound, bound),
        "b_obj_re": jax.random.uniform(ks[5], (embed_dim,), jnp.float32, -bound, bound),
        "b_sub_im": jax.random.uniform(ks[6], (embed_dim,), jnp.float32, -bound, bound),
        "b_obj_im": jax.random.uniform(ks[7], (embed_dim,), jnp.float32, -bound, bound),
        "w_rel_re": xavier_normal(ks[8], embed_dim, num_rel),   # bias=False
        "w_rel_im": xavier_normal(ks[9], embed_dim, num_rel),   # bias=False
    }


def prep_params(params, *, use_bf16=True):
    """One-time packing: stacked bf16 embedding weights [4, in, E], f32 biases [4, 1, E],
    and the two relation weight matrices padded lane-dense to a multiple of 128."""
    cdt = jnp.bfloat16 if use_bf16 else jnp.float32
    w_emb = jnp.stack([params["w_sub_re"], params["w_sub_im"],
                       params["w_obj_re"], params["w_obj_im"]], axis=0).astype(cdt)
    b_emb = jnp.stack([params["b_sub_re"], params["b_sub_im"],
                       params["b_obj_re"], params["b_obj_im"]], axis=0)[:, None, :]
    E = params["w_sub_re"].shape[1]
    num_rel = params["w_rel_re"].shape[1]
    nrp = _round_up(num_rel, 128)
    w_re = jnp.pad(params["w_rel_re"], ((0, 0), (0, nrp - num_rel))).astype(cdt)
    w_im = jnp.pad(params["w_rel_im"], ((0, 0), (0, nrp - num_rel))).astype(cdt)
    return {"w_emb": w_emb, "b_emb": b_emb, "w_re": w_re, "w_im": w_im,
            "embed_dim": E, "num_rel": num_rel}


# ------------------------------ reference ---------------------------------------

def reference_forward(params, obj_pre, union_feat, rel_ind):
    def lin(x, w, b=None):
        y = x @ w
        return y + b if b is not None else y

    sub_re = lin(obj_pre, params["w_sub_re"], params["b_sub_re"])[rel_ind[:, 1]] * union_feat
    obj_re = lin(obj_pre, params["w_obj_re"], params["b_obj_re"])[rel_ind[:, 2]] * union_feat
    sub_im = lin(obj_pre, params["w_sub_im"], params["b_sub_im"])[rel_ind[:, 1]] * union_feat
    obj_im = lin(obj_pre, params["w_obj_im"], params["b_obj_im"])[rel_ind[:, 2]] * union_feat
    return (lin(sub_re * obj_re, params["w_rel_re"])
            + lin(sub_im * obj_im, params["w_rel_re"])
            + lin(sub_re * obj_im, params["w_rel_im"])
            - lin(sub_im * obj_re, params["w_rel_im"]))


# -------------------------------- main -------------------------------------------

if __name__ == "__main__":
    input_dim, embed_dim, num_rel = 32, 32, 16
    N, R = 8, 200   # number of objects, number of relation pairs (2 tiles of 128 rows)

    key = jax.random.PRNGKey(0)
    k_par, k_obj, k_uni, k_sub, k_oidx = jax.random.split(key, 5)

    params = init_params(k_par, input_dim, embed_dim, num_rel)
    prepped = prep_params(params)   # one-time bf16 weight packing at init

    obj_pre = jax.random.normal(k_obj, (N, input_dim), dtype=jnp.float32)
    union_feat = jax.random.normal(k_uni, (R, embed_dim), dtype=jnp.float32)
    rel_ind = jnp.stack(
        [jnp.arange(R, dtype=jnp.int32),
         jax.random.randint(k_sub, (R,), 0, N, dtype=jnp.int32),
         jax.random.randint(k_oidx, (R,), 0, N, dtype=jnp.int32)],
        axis=1,
    )

    # TODO(synk): F.dropout is only active in training mode; implemented as identity (eval).
    out = complex_embed_forward(prepped, obj_pre, union_feat, rel_ind, tile_r=128)
    out = jax.block_until_ready(out)

    ref = reference_forward(params, obj_pre, union_feat, rel_ind)
    assert out.shape == (R, num_rel), out.shape

    # bf16 MXU operands (f32 accumulation) -> tolerance loosened vs the exact f32 reference.
    out_np, ref_np = np.asarray(out, dtype=np.float32), np.asarray(ref, dtype=np.float32)
    np.testing.assert_allclose(out_np, ref_np, rtol=1e-1, atol=5e-1)
    rel_l2 = np.linalg.norm(out_np - ref_np) / np.linalg.norm(ref_np)
    assert rel_l2 < 3e-2, f"relative L2 error too large: {rel_l2}"

    print("KERNEL_OK")
</pallas_src>

<mosaic_0001>
module attributes {stable_mosaic.version = 11 : i64} {
  func.func @_embed_kernel(%arg0: i32, %arg1: memref<8x32xbf16, #tpu.memory_space<vmem>>, %arg2: memref<4x32x32xbf16, #tpu.memory_space<vmem>>, %arg3: memref<4x1x32xf32, #tpu.memory_space<vmem>>, %arg4: memref<4x8x32xbf16, #tpu.memory_space<vmem>>) attributes {dimension_semantics = [#tpu.dimension_semantics<arbitrary>], iteration_bounds = array<i64: 1>, scalar_prefetch = 0 : i64, scratch_operands = 0 : i64, tpu.core_type = #tpu.core_type<tc>, window_params = [{pipeline_mode = #tpu.pipeline_mode<synchronous>, transform_indices = @transform_0, window_bounds = array<i64: 8, 32>}, {pipeline_mode = #tpu.pipeline_mode<synchronous>, transform_indices = @transform_1, window_bounds = array<i64: 4, 32, 32>}, {pipeline_mode = #tpu.pipeline_mode<synchronous>, transform_indices = @transform_2, window_bounds = array<i64: 4, 1, 32>}, {pipeline_mode = #tpu.pipeline_mode<synchronous>, transform_indices = @transform_3, window_bounds = array<i64: 4, 8, 32>}]} {
    %c0 = arith.constant 0 : index
    %c0_0 = arith.constant 0 : index
    %0 = vector.load %arg1[%c0, %c0_0] : memref<8x32xbf16, #tpu.memory_space<vmem>>, vector<8x32xbf16>
    %c0_1 = arith.constant 0 : index
    %c0_2 = arith.constant 0 : index
    %c0_3 = arith.constant 0 : index
    %1 = vector.load %arg2[%c0_1, %c0_2, %c0_3] : memref<4x32x32xbf16, #tpu.memory_space<vmem>>, vector<1x32x32xbf16>
    %2 = vector.shape_cast %1 : vector<1x32x32xbf16> to vector<32x32xbf16>
    %cst = arith.constant dense<0.000000e+00> : vector<8x32xf32>
    %3 = tpu.matmul %0, %2, %cst {dimension_numbers = #tpu.dot_dimension_numbers<[1], [0], [0], [1], [0, 0, 1, 1], [], []>} : vector<8x32xbf16>, vector<32x32xbf16>, vector<8x32xf32> -> vector<8x32xf32>
    %c0_4 = arith.constant 0 : index
    %c0_5 = arith.constant 0 : index
    %c0_6 = arith.constant 0 : index
    %4 = vector.load %arg3[%c0_4, %c0_5, %c0_6] : memref<4x1x32xf32, #tpu.memory_space<vmem>>, vector<1x1x32xf32>
    %5 = vector.shape_cast %4 : vector<1x1x32xf32> to vector<1x32xf32>
    %6 = vector.broadcast %5 : vector<1x32xf32> to vector<8x32xf32>
    %7 = arith.addf %3, %6 : vector<8x32xf32>
    %8 = arith.truncf %7 : vector<8x32xf32> to vector<8x32xbf16>
    %c0_7 = arith.constant 0 : index
    %c0_8 = arith.constant 0 : index
    %c0_9 = arith.constant 0 : index
    %9 = vector.load %arg4[%c0_7, %c0_8, %c0_9] : memref<4x8x32xbf16, #tpu.memory_space<vmem>>, vector<1x8x32xbf16>
    %10 = vector.shape_cast %9 : vector<1x8x32xbf16> to vector<8x32xbf16>
    %11 = vector.shape_cast %8 : vector<8x32xbf16> to vector<1x8x32xbf16>
    tpu.vector_store %arg4[%c0_7, %c0_8, %c0_9], %11 {strides = array<i32>} : memref<4x8x32xbf16, #tpu.memory_space<vmem>>, vector<1x8x32xbf16>,
    %c1 = arith.constant 1 : index
    %c0_10 = arith.constant 0 : index
    %c0_11 = arith.constant 0 : index
    %12 = vector.load %arg2[%c1, %c0_10, %c0_11] : memref<4x32x32xbf16, #tpu.memory_space<vmem>>, vector<1x32x32xbf16>
    %13 = vector.shape_cast %12 : vector<1x32x32xbf16> to vector<32x32xbf16>
    %cst_12 = arith.constant dense<0.000000e+00> : vector<8x32xf32>
    %14 = tpu.matmul %0, %13, %cst_12 {dimension_numbers = #tpu.dot_dimension_numbers<[1], [0], [0], [1], [0, 0, 1, 1], [], []>} : vector<8x32xbf16>, vector<32x32xbf16>, vector<8x32xf32> -> vector<8x32xf32>
    %c1_13 = arith.constant 1 : index
    %c0_14 = arith.constant 0 : index
    %c0_15 = arith.constant 0 : index
    %15 = vector.load %arg3[%c1_13, %c0_14, %c0_15] : memref<4x1x32xf32, #tpu.memory_space<vmem>>, vector<1x1x32xf32>
    %16 = vector.shape_cast %15 : vector<1x1x32xf32> to vector<1x32xf32>
    %17 = vector.broadcast %16 : vector<1x32xf32> to vector<8x32xf32>
    %18 = arith.addf %14, %17 : vector<8x32xf32>
    %19 = arith.truncf %18 : vector<8x32xf32> to vector<8x32xbf16>
    %c1_16 = arith.constant 1 : index
    %c0_17 = arith.constant 0 : index
    %c0_18 = arith.constant 0 : index
    %20 = vector.load %arg4[%c1_16, %c0_17, %c0_18] : memref<4x8x32xbf16, #tpu.memory_space<vmem>>, vector<1x8x32xbf16>
    %21 = vector.shape_cast %20 : vector<1x8x32xbf16> to vector<8x32xbf16>
    %22 = vector.shape_cast %19 : vector<8x32xbf16> to vector<1x8x32xbf16>
    tpu.vector_store %arg4[%c1_16, %c0_17, %c0_18], %22 {strides = array<i32>} : memref<4x8x32xbf16, #tpu.memory_space<vmem>>, vector<1x8x32xbf16>,
    %c2 = arith.constant 2 : index
    %c0_19 = arith.constant 0 : index
    %c0_20 = arith.constant 0 : index
    %23 = vector.load %arg2[%c2, %c0_19, %c0_20] : memref<4x32x32xbf16, #tpu.memory_space<vmem>>, vector<1x32x32xbf16>
    %24 = vector.shape_cast %23 : vector<1x32x32xbf16> to vector<32x32xbf16>
    %cst_21 = arith.constant dense<0.000000e+00> : vector<8x32xf32>
    %25 = tpu.matmul %0, %24, %cst_21 {dimension_numbers = #tpu.dot_dimension_numbers<[1], [0], [0], [1], [0, 0, 1, 1], [], []>} : vector<8x32xbf16>, vector<32x32xbf16>, vector<8x32xf32> -> vector<8x32xf32>
    %c2_22 = arith.constant 2 : index
    %c0_23 = arith.constant 0 : index
    %c0_24 = arith.constant 0 : index
    %26 = vector.load %arg3[%c2_22, %c0_23, %c0_24] : memref<4x1x32xf32, #tpu.memory_space<vmem>>, vector<1x1x32xf32>
    %27 = vector.shape_cast %26 : vector<1x1x32xf32> to vector<1x32xf32>
    %28 = vector.broadcast %27 : vector<1x32xf32> to vector<8x32xf32>
    %29 = arith.addf %25, %28 : vector<8x32xf32>
    %30 = arith.truncf %29 : vector<8x32xf32> to vector<8x32xbf16>
    %c2_25 = arith.constant 2 : index
    %c0_26 = arith.constant 0 : index
    %c0_27 = arith.constant 0 : index
    %31 = vector.load %arg4[%c2_25, %c0_26, %c0_27] : memref<4x8x32xbf16, #tpu.memory_space<vmem>>, vector<1x8x32xbf16>
    %32 = vector.shape_cast %31 : vector<1x8x32xbf16> to vector<8x32xbf16>
    %33 = vector.shape_cast %30 : vector<8x32xbf16> to vector<1x8x32xbf16>
    tpu.vector_store %arg4[%c2_25, %c0_26, %c0_27], %33 {strides = array<i32>} : memref<4x8x32xbf16, #tpu.memory_space<vmem>>, vector<1x8x32xbf16>,
    %c3 = arith.constant 3 : index
    %c0_28 = arith.constant 0 : index
    %c0_29 = arith.constant 0 : index
    %34 = vector.load %arg2[%c3, %c0_28, %c0_29] : memref<4x32x32xbf16, #tpu.memory_space<vmem>>, vector<1x32x32xbf16>
    %35 = vector.shape_cast %34 : vector<1x32x32xbf16> to vector<32x32xbf16>
    %cst_30 = arith.constant dense<0.000000e+00> : vector<8x32xf32>
    %36 = tpu.matmul %0, %35, %cst_30 {dimension_numbers = #tpu.dot_dimension_numbers<[1], [0], [0], [1], [0, 0, 1, 1], [], []>} : vector<8x32xbf16>, vector<32x32xbf16>, vector<8x32xf32> -> vector<8x32xf32>
    %c3_31 = arith.constant 3 : index
    %c0_32 = arith.constant 0 : index
    %c0_33 = arith.constant 0 : index
    %37 = vector.load %arg3[%c3_31, %c0_32, %c0_33] : memref<4x1x32xf32, #tpu.memory_space<vmem>>, vector<1x1x32xf32>
    %38 = vector.shape_cast %37 : vector<1x1x32xf32> to vector<1x32xf32>
    %39 = vector.broadcast %38 : vector<1x32xf32> to vector<8x32xf32>
    %40 = arith.addf %36, %39 : vector<8x32xf32>
    %41 = arith.truncf %40 : vector<8x32xf32> to vector<8x32xbf16>
    %c3_34 = arith.constant 3 : index
    %c0_35 = arith.constant 0 : index
    %c0_36 = arith.constant 0 : index
    %42 = vector.load %arg4[%c3_34, %c0_35, %c0_36] : memref<4x8x32xbf16, #tpu.memory_space<vmem>>, vector<1x8x32xbf16>
    %43 = vector.shape_cast %42 : vector<1x8x32xbf16> to vector<8x32xbf16>
    %44 = vector.shape_cast %41 : vector<8x32xbf16> to vector<1x8x32xbf16>
    tpu.vector_store %arg4[%c3_34, %c0_35, %c0_36], %44 {strides = array<i32>} : memref<4x8x32xbf16, #tpu.memory_space<vmem>>, vector<1x8x32xbf16>,
    return
  }
  func.func @transform_0(%arg0: i32) -> (i32, i32) {
    %c0_i32 = arith.constant 0 : i32
    %c0_i32_0 = arith.constant 0 : i32
    %c0_i32_1 = arith.constant 0 : i32
    return %c0_i32, %c0_i32_0 : i32, i32
  }
  func.func @transform_1(%arg0: i32) -> (i32, i32, i32) {
    %c0_i32 = arith.constant 0 : i32
    %c0_i32_0 = arith.constant 0 : i32
    %c0_i32_1 = arith.constant 0 : i32
    %c0_i32_2 = arith.constant 0 : i32
    return %c0_i32, %c0_i32_0, %c0_i32_1 : i32, i32, i32
  }
  func.func @transform_2(%arg0: i32) -> (i32, i32, i32) {
    %c0_i32 = arith.constant 0 : i32
    %c0_i32_0 = arith.constant 0 : i32
    %c0_i32_1 = arith.constant 0 : i32
    %c0_i32_2 = arith.constant 0 : i32
    return %c0_i32, %c0_i32_0, %c0_i32_1 : i32, i32, i32
  }
  func.func @transform_3(%arg0: i32) -> (i32, i32, i32) {
    %c0_i32 = arith.constant 0 : i32
    %c0_i32_0 = arith.constant 0 : i32
    %c0_i32_1 = arith.constant 0 : i32
    %c0_i32_2 = arith.constant 0 : i32
    return %c0_i32, %c0_i32_0, %c0_i32_1 : i32, i32, i32
  }
}

</mosaic_0001>

<bundles_post_ra>
// kernel: tpu_custom_call.1
= control target key start
LH: loop header
LB: loop body
LE: loop exit
PB: predicated region body
PF: predicated region fallthrough
CT: control target
= control target key end

     0   :  { %8 = vsyncpa [#allocation3], 0  ;;  %s572_s0 = inlined_call_operand.hbm [shape: bf16[8,32], index: 0, kind: input, shape index: {}]   ;;  %s573_s1 = inlined_call_operand.hbm [shape: bf16[4,32,32], index: 1, kind: input, shape index: {}]   ;;  %s574_s2 = inlined_call_operand.hbm [shape: f32[4,1,32], index: 2, kind: input, shape index: {}]   ;;  %s575_s3 = inlined_call_operand.hbm [shape: bf16[4,8,32], index: 3, kind: output, shape index: {}]  }
   0x1   :  { %9 = vsyncpa [#allocation6], 0 }
   0x2   :  { %10 = vsyncpa [#allocation4], 0  ;;  %s512_s12 = smov [#allocation5]  }
   0x3   :  { %s26_s13 = sshll.u32 %s512_s12, 4  ;;  %s27_s13 = int_to_ptr.vmem [resolvable:$true] %s26_s13 }
   0x4   :  { %s434_s14 = scalar_lea.vmem %s27_s13, 1024  ;;  %p439_p1 = scmp.lt.s32.totalorder %s27_s13, %s27_s13 }
   0x5   :  { %p435_p0 = scmp.ne.s32.totalorder %s27_s13, %s434_s14  ;;  %p440_p2 = scmp.lt.s32.totalorder %s434_s14, %s434_s14 }
   0x7   :  { %p441_p3 = por %p440_p2, %p439_p1 }
   0x9   :  { %p442_p4 = pnand %p441_p3, %p435_p0 }
   0xb   :  { %445 = shalt.err (!%p442_p4)
}
   0xc   :  { %s513_s15 = smov 64   ;;  %s514_s16 = smov 4  }
   0xd   :  { %32 = dma.hbm_to_vmem [thread:$0]  %s573_s1, 1024, %s27_s13, [#allocation6], %s513_s15, %s513_s15, %s514_s16  }
   0xe   :  { %s515_s19 = smov [#allocation2]   ;;  %s516_s21 = smov [#allocation7]  }
   0xf   :  { %s17_s20 = sshll.u32 %s515_s19, 4  ;;  %s38_s22 = sshll.u32 %s516_s21, 4  ;;  %s18_s20 = int_to_ptr.vmem [resolvable:$true] %s17_s20  ;;  %s39_s22 = int_to_ptr.vmem [resolvable:$true] %s38_s22 }
  0x10   :  { %s454_s23 = scalar_lea.vmem %s18_s20, 64  ;;  %p459_p6 = scmp.lt.s32.totalorder %s18_s20, %s18_s20 }
  0x11   :  { %p455_p5 = scmp.ne.s32.totalorder %s18_s20, %s454_s23  ;;  %p460_p7 = scmp.lt.s32.totalorder %s454_s23, %s454_s23 }
  0x13   :  { %p461_p8 = por %p460_p7, %p459_p6 }
  0x15   :  { %p462_p9 = pnand %p461_p8, %p455_p5 }
  0x17   :  { %465 = shalt.err (!%p462_p9)
}
  0x18   :  { %20 = dma.hbm_to_vmem [thread:$0]  %s572_s0, 64, %s18_s20, [#allocation3]  }
  0x19   :  { %s474_s26 = scalar_lea.vmem %s39_s22, 64  ;;  %p479_p11 = scmp.lt.s32.totalorder %s39_s22, %s39_s22 }
  0x1a   :  { %p475_p10 = scmp.ne.s32.totalorder %s39_s22, %s474_s26  ;;  %p480_p12 = scmp.lt.s32.totalorder %s474_s26, %s474_s26 }
  0x1c   :  { %p481_p13 = por %p480_p12, %p479_p11 }
  0x1e   :  { %p482_p0 = pnand %p481_p13, %p475_p10 }
  0x20   :  { %485 = shalt.err (!%p482_p0)
}
  0x21   :  { %s517_s1 = smov 16   ;;  %s518_s27 = smov 1  }
  0x22   :  { %44 = dma.hbm_to_vmem [thread:$0]  %s574_s2, 64, %s39_s22, [#allocation6], %s517_s1, %s517_s1, %s518_s27  }
  0x23   :  { %506 = dma.done.wait [#allocation3], 64  }
  0x24   :  { %507 = vsyncadd [#allocation3], 4294967232 }
  0x25   :  { %508 = dma.done.wait [#allocation6], 1088  }
  0x26   :  { %509 = vsyncadd [#allocation6], 4294966208  ;;  %v519_v0 = vmov 0.0   ;;  %vm520_vm0 = vmmov 0   ;;  %v418_v1 = vld [vmem:[#allocation5 + $0x8] sm:$0xff]   ;;  %v419_v2 = vld [vmem:[#allocation5 + $0x18] sm:$0xff]  }
  0x27   :  { %376 = vmatprep.subr.bf16.mxu0 %v519_v0  ;;  %384 = vmatprep.subr.bf16.mxu1 %v519_v0  ;;  %v420_v3 = vld [vmem:[#allocation5] sm:$0xff]   ;;  %v421_v4 = vld [vmem:[#allocation5 + $0x10] sm:$0xff]   ;;  %v55_v5 = vld [vmem:[#allocation2] sm:$0xf]  ;;  %vm79_vm1 = vcmask 261120   ;;  %vm124_vm2 = vcmask 257024  }
  0x28   :  { %380 = vmatprep.mubr.msk.bf16.mxu0 %vm520_vm0, %v519_v0  ;;  %388 = vmatprep.mubr.msk.bf16.mxu1 %vm520_vm0, %v519_v0  ;;  %v422_v6 = vld [vmem:[#allocation5 + $0x28] sm:$0xff]   ;;  %v423_v7 = vld [vmem:[#allocation5 + $0x38] sm:$0xff]   ;;  %v424_v8 = vld [vmem:[#allocation5 + $0x20] sm:$0xff]   ;;  %s521_s0 = smov [#allocation8]  }
  0x29   :  { %377 = vmatpush3.bf16.msra.mxu0 %v418_v1  ;;  %385 = vmatpush3.bf16.msra.mxu1 %v419_v2  ;;  %v425_v9 = vld [vmem:[#allocation5 + $0x30] sm:$0xff]   ;;  %v348_v10 = vld [vmem:[#allocation7] ss:$0 sm:$0xff]  ;;  %v352_v11 = vld [vmem:[#allocation7 + $0x1] ss:$0 sm:$0xff]  ;;  %s335_s2 = sshll.u32 %s521_s0, 4  ;;  %s336_s2 = int_to_ptr.vmem [resolvable:$true] %s335_s2 }
  0x2a   :  { %378 = vmatprep.subr.bf16.mxu0 %v519_v0  ;;  %386 = vmatprep.subr.bf16.mxu1 %v519_v0  ;;  %v356_v23 = vld [vmem:[#allocation7 + $0x2] ss:$0 sm:$0xff]  ;;  %v360_v25 = vld [vmem:[#allocation7 + $0x3] ss:$0 sm:$0xff]  ;;  %s486_s30 = scalar_lea.vmem %s336_s2, 256  ;;  %p491_p2 = scmp.lt.s32.totalorder %s336_s2, %s336_s2 }
  0x2b   :  { %p487_p1 = scmp.ne.s32.totalorder %s336_s2, %s486_s30  ;;  %p492_p3 = scmp.lt.s32.totalorder %s486_s30, %s486_s30 }
  0x2d   :  { %379 = vmatpush3.bf16.msra.mxu0 %v420_v3  ;;  %387 = vmatpush3.bf16.msra.mxu1 %v421_v4  ;;  %p493_p4 = por %p492_p3, %p491_p2 }
  0x2e   :  { %392 = vmatprep.subr.bf16.mxu0 %v519_v0  ;;  %400 = vmatprep.subr.bf16.mxu1 %v519_v0 }
  0x2f   :  { %p494_p5 = pnand %p493_p4, %p487_p1 }
  0x30   :  { %381 = vmatmul.mubr.msk.bf16.vlgmr.msra.gmra.mxu0 %vm79_vm1, %v55_v5  ;;  %389 = vmatmul.mubr.msk.bf16.vlgmr.msra.gmra.mxu1 %vm79_vm1, %v55_v5 }
  0x31   :  { %393 = vmatpush3.bf16.msra.mxu0 %v422_v6  ;;  %401 = vmatpush3.bf16.msra.mxu1 %v423_v7 }
  0x32   :  { %394 = vmatprep.subr.bf16.mxu0 %v519_v0  ;;  %402 = vmatprep.subr.bf16.mxu1 %v519_v0 }
  0x33   :  { %396 = vmatprep.mubr.msk.bf16.mxu0 %vm520_vm0, %v519_v0  ;;  %404 = vmatprep.mubr.msk.bf16.mxu1 %vm520_vm0, %v519_v0 }
  0x35   :  { %395 = vmatpush3.bf16.msra.mxu0 %v424_v8  ;;  %403 = vmatpush3.bf16.msra.mxu1 %v425_v9 }
  0x38   :  { %397 = vmatmul.mubr.msk.bf16.vlgmr.msra.gmra.mxu0 %vm79_vm1, %v55_v5  ;;  %405 = vmatmul.mubr.msk.bf16.vlgmr.msra.gmra.mxu1 %vm79_vm1, %v55_v5 }
  0xf0   :  { %v117_v12 = vpop.f32.mrf.mxu0  ;;  %v185_v14 = vpop.f32.mrf.mxu1 }
  0xf1   :  { %v118_v13 = vadd.f32 %v348_v10, %v117_v12  ;;  %v186_v15 = vadd.f32 %v352_v11, %v185_v14 }
  0xf2   :  { %v382_v16 = vpop.f32.mrf.mxu0  ;;  %v390_v18 = vpop.f32.mrf.mxu1 }
  0xf3   :  { %v123_v17 = vpack.c.bf16 %v118_v13, %v118_v13  ;;  %v191_v19 = vpack.c.bf16 %v186_v15, %v186_v15 }
  0xf4   :  { %v120_v20 = vpop.f32.mrf.mxu0  ;;  %v188_v21 = vpop.f32.mrf.mxu1 }
  0xf5   :  { %125 = vst.msk [vmem:[#allocation8] sm:$0xf] %vm124_vm2, %v123_v17  ;;  %193 = vst.msk [vmem:[#allocation8 + $0x4] sm:$0xf] %vm124_vm2, %v191_v19 }
  0xf6   :  { %v383_v22 = vpop.f32.mrf.mxu0  ;;  %v391_v24 = vpop.f32.mrf.mxu1 }
  0xf8   :  { %v253_v26 = vpop.f32.mrf.mxu0  ;;  %v321_v28 = vpop.f32.mrf.mxu1 }
  0xf9   :  { %v254_v27 = vadd.f32 %v356_v23, %v253_v26  ;;  %v322_v29 = vadd.f32 %v360_v25, %v321_v28 }
  0xfa   :  { %v398_v30 = vpop.f32.mrf.mxu0  ;;  %v406_v32 = vpop.f32.mrf.mxu1 }
  0xfb   :  { %v259_v31 = vpack.c.bf16 %v254_v27, %v254_v27  ;;  %v327_v33 = vpack.c.bf16 %v322_v29, %v322_v29 }
  0xfc   :  { %v256_v34 = vpop.f32.mrf.mxu0  ;;  %v324_v35 = vpop.f32.mrf.mxu1 }
  0xfd   :  { %261 = vst.msk [vmem:[#allocation8 + $0x8] sm:$0xf] %vm124_vm2, %v259_v31  ;;  %329 = vst.msk [vmem:[#allocation8 + $0xc] sm:$0xf] %vm124_vm2, %v327_v33 }
  0xfe   :  { %v399_v36 = vpop.f32.mrf.mxu0  ;;  %v407_v37 = vpop.f32.mrf.mxu1 }
  0xff   :  { %497 = shalt.err (!%p494_p5)
}
 0x100   :  { %341 = dma.vmem_to_hbm [thread:$0]  %s336_s2, 256, %s575_s3, [#allocation4], %s513_s15, %s513_s15, %s514_s16  }
 0x101   :  { %510 = dma.done.wait [#allocation4], 256  }
 0x102   :  { %511 = vsyncadd [#allocation4], 4294967040 }
 0x103   :  { %345 = vsyncpa [#allocation3], 1 }
 0x104   :  { %346 = vsyncpa [#allocation6], 1 }
 0x105   :  { %347 = vsyncpa [#allocation4], 1 }

</bundles_post_ra>
